<compile_context>
chip_gen: v6e
topology: v6e:2x2x1
jax: 0.10.0
libtpu: 0.0.40
codegen_flags: <defaults>
</compile_context>

<pallas_src>
import jax
import jax.numpy as jnp
from jax.experimental import pallas as pl
from jax.experimental.pallas import tpu as pltpu


LANES = 128            # vreg lane count (last-dim tiling)
SUBLANES_BF16 = 16     # bf16 packs 16 rows per vreg (dtype-aware sublane pad)
BM_CAP = 256           # fixed batch-tile cap (matches v6e/v7x 256-wide MXU)
K_TILE = 1024          # K tile for the gridded-reduction fallback (128/256-mult)
VMEM_BUDGET = 40 * 1024 * 1024   # stay well under v7x's 64 MiB physical VMEM


def _round_up(x, m):
    return ((x + m - 1) // m) * m


def _pad2d(a, rows, cols):
    pr, pc = rows - a.shape[0], cols - a.shape[1]
    if pr == 0 and pc == 0:
        return a
    return jnp.pad(a, ((0, pr), (0, pc)))        # zero padding is exact for dots


# ---------------------------------------------------------------------------
# Kernels
# ---------------------------------------------------------------------------
def _mlp_kernel(x_ref, w1_ref, b1_ref, w2_ref, b2_ref, o_ref):
    """Single pass (K fully resident): out = relu(x @ W1 + b1) @ W2 + b2."""
    h = jnp.dot(x_ref[...], w1_ref[...], preferred_element_type=jnp.float32)
    h = jnp.maximum(h + b1_ref[...], 0.0)                      # f32 bias + ReLU
    o_ref[...] = (jnp.dot(h.astype(w2_ref.dtype), w2_ref[...],
                          preferred_element_type=jnp.float32)
                  + b2_ref[...])                               # lane-dense store


def _mlp_kernel_ktiled(x_ref, w1_ref, b1_ref, w2_ref, b2_ref, o_ref, h_acc):
    """Fallback for large D: K reduction tiled on the last grid axis."""
    k = pl.program_id(2)

    @pl.when(k == 0)
    def _():
        h_acc[...] = jnp.zeros_like(h_acc)

    h_acc[...] += jnp.dot(x_ref[...], w1_ref[...],
                          preferred_element_type=jnp.float32)

    @pl.when(k == pl.num_programs(2) - 1)
    def _():
        h = jnp.maximum(h_acc[...] + b1_ref[...], 0.0)
        o_ref[...] = (jnp.dot(h.astype(w2_ref.dtype), w2_ref[...],
                              preferred_element_type=jnp.float32)
                      + b2_ref[...])


# ---------------------------------------------------------------------------
# One-time parameter preparation (pad + cast; decides the K strategy)
# ---------------------------------------------------------------------------
def prepare_params(params):
    """Pad/cast weights to their kernel layouts once (bf16 weights, f32 biases)."""
    w1, b1, w2, b2 = params
    w1, w2 = jnp.asarray(w1), jnp.asarray(w2)
    b1 = jnp.asarray(b1).reshape(1, -1)            # accept (H,) or (1, H)
    b2 = jnp.asarray(b2).reshape(1, -1)

    D, H = w1.shape
    E = w2.shape[1]
    H_pad = _round_up(H, LANES)
    E_pad = _round_up(E, LANES)
    D_pad = _round_up(D, LANES)

    # Can the whole K (=D) reduction stay resident for the worst-case bm?
    single_bytes = (2 * BM_CAP * D_pad * 2        # x tile, double-buffered bf16
                    + 2 * D_pad * H_pad * 2       # W1 (conservative: 2 bufs)
                    + 2 * H_pad * E_pad * 2       # W2
                    + BM_CAP * H_pad * 4          # hidden activations (f32)
                    + 2 * BM_CAP * E_pad * 4      # out tile, double-buffered f32
                    + 4 * (H_pad + E_pad) * 4)    # biases
    single_pass = single_bytes <= VMEM_BUDGET
    if single_pass:
        tk = D_pad
    else:
        tk = min(K_TILE, D_pad)
        D_pad = _round_up(D_pad, tk)

    # TODO(synk): tile the E (output) axis too if H_pad*E_pad bf16 grows past a
    # few MiB (very large embedding nets would otherwise pressure v7x's 64 MiB).
    return dict(
        w1=_pad2d(w1, D_pad, H_pad).astype(jnp.bfloat16),
        b1=_pad2d(b1, 1, H_pad).astype(jnp.float32),
        w2=_pad2d(w2, H_pad, E_pad).astype(jnp.bfloat16),
        b2=_pad2d(b2, 1, E_pad).astype(jnp.float32),
        d_in=D, d_hidden=H, d_embed=E,
        D_pad=D_pad, H_pad=H_pad, E_pad=E_pad,
        tk=tk, single_pass=single_pass)


# ---------------------------------------------------------------------------
# One pallas_call over all branches (leading branch axis = parallel grid axis)
# ---------------------------------------------------------------------------
def _embed_stacked(branches, prep):
    """branches: list of (B, D) bf16 arrays.  Returns (S, B, E) f32."""
    S = len(branches)
    B, D = branches[0].shape
    assert D == prep["d_in"], "input feature dim does not match the weights"
    D_pad, H_pad, E_pad = prep["D_pad"], prep["H_pad"], prep["E_pad"]
    tk = prep["tk"]

    # Fixed batch tile (never the whole batch); dtype-aware sublane padding.
    M_pad = _round_up(B, SUBLANES_BF16)
    bm = min(BM_CAP, M_pad)
    M_pad = _round_up(M_pad, bm)

    x_stk = jnp.stack([_pad2d(x, M_pad, D_pad) for x in branches])  # (S,M_pad,D_pad) bf16
    w1_p, b1_p, w2_p, b2_p = prep["w1"], prep["b1"], prep["w2"], prep["b2"]

    flops = S * (2 * M_pad * D_pad * H_pad + 2 * M_pad * H_pad * E_pad)
    bytes_accessed = (x_stk.size * 2 + w1_p.size * 2 + w2_p.size * 2
                      + b1_p.size * 4 + b2_p.size * 4 + S * M_pad * E_pad * 4)

    # Explicit VMEM limit derived from the actual tile budget (v7x-safe cap).
    est = (2 * bm * tk * 2 + 2 * tk * H_pad * 2 + 2 * H_pad * E_pad * 2
           + bm * H_pad * 4 + 2 * bm * E_pad * 4 + 4 * (H_pad + E_pad) * 4)
    vmem_limit = int(min(48 * 1024 * 1024,
                         max(16 * 1024 * 1024, est * 5 // 4)))

    if prep["single_pass"]:
        kernel = _mlp_kernel
        grid = (S, M_pad // bm)
        in_specs = [
            pl.BlockSpec((None, bm, D_pad), lambda s, i: (s, i, 0)),   # x tile
            pl.BlockSpec((D_pad, H_pad), lambda s, i: (0, 0)),         # W1
            pl.BlockSpec((1, H_pad), lambda s, i: (0, 0)),             # b1
            pl.BlockSpec((H_pad, E_pad), lambda s, i: (0, 0)),         # W2
            pl.BlockSpec((1, E_pad), lambda s, i: (0, 0)),             # b2
        ]
        out_specs = pl.BlockSpec((None, bm, E_pad), lambda s, i: (s, i, 0))
        scratch = []
        dim_sem = ("parallel", "parallel")
    else:
        kernel = _mlp_kernel_ktiled
        grid = (S, M_pad // bm, D_pad // tk)
        in_specs = [
            pl.BlockSpec((None, bm, tk), lambda s, i, k: (s, i, k)),
            pl.BlockSpec((tk, H_pad), lambda s, i, k: (k, 0)),
            pl.BlockSpec((1, H_pad), lambda s, i, k: (0, 0)),
            pl.BlockSpec((H_pad, E_pad), lambda s, i, k: (0, 0)),
            pl.BlockSpec((1, E_pad), lambda s, i, k: (0, 0)),
        ]
        out_specs = pl.BlockSpec((None, bm, E_pad), lambda s, i, k: (s, i, 0))
        scratch = [pltpu.VMEM((bm, H_pad), jnp.float32)]
        dim_sem = ("parallel", "parallel", "arbitrary")

    out_pad = pl.pallas_call(
        kernel,
        out_shape=jax.ShapeDtypeStruct((S, M_pad, E_pad), jnp.float32),
        grid_spec=pltpu.PrefetchScalarGridSpec(
            num_scalar_prefetch=0,
            grid=grid,
            in_specs=in_specs,
            out_specs=out_specs,
            scratch_shapes=scratch),
        compiler_params=pltpu.CompilerParams(
            dimension_semantics=dim_sem,
            vmem_limit_bytes=vmem_limit),
        cost_estimate=pl.CostEstimate(
            flops=flops, transcendentals=0, bytes_accessed=bytes_accessed),
    )(x_stk, w1_p, b1_p, w2_p, b2_p)

    return out_pad[:, :B, :prep["d_embed"]]


# ---------------------------------------------------------------------------
# SiameseNet forward (both branches fused into one launch) + get_embedding
# ---------------------------------------------------------------------------
def siamese_forward(x1, x2, prep):
    B = x1.shape[0]
    x1f = x1.reshape(B, -1).astype(jnp.bfloat16)   # torch x.view(B, -1); bf16 MXU operand
    x2f = x2.reshape(B, -1).astype(jnp.bfloat16)
    out = _embed_stacked([x1f, x2f], prep)         # (2, B, E) in ONE kernel
    return out[0], out[1]


def get_embedding(x, prep):
    B = x.shape[0]
    return _embed_stacked([x.reshape(B, -1).astype(jnp.bfloat16)], prep)[0]


# ---------------------------------------------------------------------------
# Deterministic parameter construction (synthetic, no checkpoint load)
# ---------------------------------------------------------------------------
def init_params(key, d_in, d_hidden, d_embed):
    k1, k2, k3, k4 = jax.random.split(key, 4)
    w1 = jax.random.normal(k1, (d_in, d_hidden), jnp.float32) * (1.0 / d_in ** 0.5)
    b1 = jax.random.normal(k2, (d_hidden,), jnp.float32) * 0.01      # 1-D torch-style bias
    w2 = jax.random.normal(k3, (d_hidden, d_embed), jnp.float32) * (1.0 / d_hidden ** 0.5)
    b2 = jax.random.normal(k4, (d_embed,), jnp.float32) * 0.01
    return (w1, b1, w2, b2)


if __name__ == "__main__":
    # Small shapes consistent with a Siamese forward over image-like inputs.
    B, C, H, W = 2, 4, 16, 16
    D = C * H * W              # 1024
    HID, EMB = 128, 32

    key = jax.random.PRNGKey(0)
    kx1, kx2, kp = jax.random.split(key, 3)
    x1 = jax.random.normal(kx1, (B, C, H, W), jnp.float32)   # NCHW
    x2 = jax.random.normal(kx2, (B, C, H, W), jnp.float32)   # NCHW
    params = init_params(kp, D, HID, EMB)
    prep = prepare_params(params)      # one-time bf16 pad/cast of shared weights

    out1, out2 = siamese_forward(x1, x2, prep)
    jax.block_until_ready((out1, out2))

    # Pure-JAX reference using the same bf16-operand / f32-accumulate math.
    def ref_embed(x):
        xf = x.reshape(x.shape[0], -1).astype(jnp.bfloat16)
        h = jnp.dot(xf, params[0].astype(jnp.bfloat16),
                    preferred_element_type=jnp.float32) + params[1]
        h = jnp.maximum(h, 0.0)
        return jnp.dot(h.astype(jnp.bfloat16), params[2].astype(jnp.bfloat16),
                       preferred_element_type=jnp.float32) + params[3]

    r1, r2 = ref_embed(x1), ref_embed(x2)
    assert out1.shape == (B, EMB) and out2.shape == (B, EMB)
    assert jnp.allclose(out1, r1, atol=1e-2, rtol=1e-2)
    assert jnp.allclose(out2, r2, atol=1e-2, rtol=1e-2)

    emb = get_embedding(x1, prep)
    assert emb.shape == (B, EMB)
    assert jnp.allclose(emb, r1, atol=1e-2, rtol=1e-2)

    print("KERNEL_OK")
</pallas_src>

<mosaic_0001>
module attributes {stable_mosaic.version = 11 : i64} {
  func.func @_mlp_kernel(%arg0: i32, %arg1: i32, %arg2: memref<1x16x1024xbf16, #tpu.memory_space<vmem>>, %arg3: memref<1024x128xbf16, #tpu.memory_space<vmem>>, %arg4: memref<1x128xf32, #tpu.memory_space<vmem>>, %arg5: memref<128x128xbf16, #tpu.memory_space<vmem>>, %arg6: memref<1x128xf32, #tpu.memory_space<vmem>>, %arg7: memref<1x16x128xf32, #tpu.memory_space<vmem>>) attributes {dimension_semantics = [#tpu.dimension_semantics<parallel>, #tpu.dimension_semantics<parallel>], iteration_bounds = array<i64: 2, 1>, scalar_prefetch = 0 : i64, scratch_operands = 0 : i64, tpu.core_type = #tpu.core_type<tc>, window_params = [{transform_indices = @transform_0, window_bounds = array<i64: 1, 16, 1024>}, {pipeline_mode = #tpu.pipeline_mode<synchronous>, transform_indices = @transform_1, window_bounds = array<i64: 1024, 128>}, {pipeline_mode = #tpu.pipeline_mode<synchronous>, transform_indices = @transform_2, window_bounds = array<i64: 1, 128>}, {pipeline_mode = #tpu.pipeline_mode<synchronous>, transform_indices = @transform_3, window_bounds = array<i64: 128, 128>}, {pipeline_mode = #tpu.pipeline_mode<synchronous>, transform_indices = @transform_4, window_bounds = array<i64: 1, 128>}, {transform_indices = @transform_5, window_bounds = array<i64: 1, 16, 128>}]} {
    %c0 = arith.constant 0 : index
    %c0_0 = arith.constant 0 : index
    %c0_1 = arith.constant 0 : index
    %0 = vector.load %arg2[%c0, %c0_0, %c0_1] : memref<1x16x1024xbf16, #tpu.memory_space<vmem>>, vector<1x16x1024xbf16>
    %1 = vector.shape_cast %0 : vector<1x16x1024xbf16> to vector<16x1024xbf16>
    %c0_2 = arith.constant 0 : index
    %c0_3 = arith.constant 0 : index
    %2 = vector.load %arg3[%c0_2, %c0_3] : memref<1024x128xbf16, #tpu.memory_space<vmem>>, vector<1024x128xbf16>
    %cst = arith.constant dense<0.000000e+00> : vector<16x128xf32>
    %3 = tpu.matmul %1, %2, %cst {dimension_numbers = #tpu.dot_dimension_numbers<[1], [0], [0], [1], [0, 0, 1, 1], [], []>} : vector<16x1024xbf16>, vector<1024x128xbf16>, vector<16x128xf32> -> vector<16x128xf32>
    %c0_4 = arith.constant 0 : index
    %c0_5 = arith.constant 0 : index
    %4 = vector.load %arg4[%c0_4, %c0_5] : memref<1x128xf32, #tpu.memory_space<vmem>>, vector<1x128xf32>
    %5 = vector.broadcast %4 : vector<1x128xf32> to vector<16x128xf32>
    %6 = arith.addf %3, %5 : vector<16x128xf32>
    %cst_6 = arith.constant 0.000000e+00 : f32
    %7 = vector.broadcast %cst_6 : f32 to vector<16x128xf32>
    %8 = arith.maximumf %6, %7 : vector<16x128xf32>
    %9 = arith.truncf %8 : vector<16x128xf32> to vector<16x128xbf16>
    %c0_7 = arith.constant 0 : index
    %c0_8 = arith.constant 0 : index
    %10 = vector.load %arg5[%c0_7, %c0_8] : memref<128x128xbf16, #tpu.memory_space<vmem>>, vector<128x128xbf16>
    %cst_9 = arith.constant dense<0.000000e+00> : vector<16x128xf32>
    %11 = tpu.matmul %9, %10, %cst_9 {dimension_numbers = #tpu.dot_dimension_numbers<[1], [0], [0], [1], [0, 0, 1, 1], [], []>} : vector<16x128xbf16>, vector<128x128xbf16>, vector<16x128xf32> -> vector<16x128xf32>
    %c0_10 = arith.constant 0 : index
    %c0_11 = arith.constant 0 : index
    %12 = vector.load %arg6[%c0_10, %c0_11] : memref<1x128xf32, #tpu.memory_space<vmem>>, vector<1x128xf32>
    %13 = vector.broadcast %12 : vector<1x128xf32> to vector<16x128xf32>
    %14 = arith.addf %11, %13 : vector<16x128xf32>
    %c0_12 = arith.constant 0 : index
    %c0_13 = arith.constant 0 : index
    %c0_14 = arith.constant 0 : index
    %15 = vector.load %arg7[%c0_12, %c0_13, %c0_14] : memref<1x16x128xf32, #tpu.memory_space<vmem>>, vector<1x16x128xf32>
    %16 = vector.shape_cast %15 : vector<1x16x128xf32> to vector<16x128xf32>
    %17 = vector.shape_cast %14 : vector<16x128xf32> to vector<1x16x128xf32>
    tpu.vector_store %arg7[%c0_12, %c0_13, %c0_14], %17 {strides = array<i32>} : memref<1x16x128xf32, #tpu.memory_space<vmem>>, vector<1x16x128xf32>,
    return
  }
  func.func @transform_0(%arg0: i32, %arg1: i32) -> (i32, i32, i32) {
    %c0_i32 = arith.constant 0 : i32
    %c0_i32_0 = arith.constant 0 : i32
    return %arg0, %arg1, %c0_i32 : i32, i32, i32
  }
  func.func @transform_1(%arg0: i32, %arg1: i32) -> (i32, i32) {
    %c0_i32 = arith.constant 0 : i32
    %c0_i32_0 = arith.constant 0 : i32
    %c0_i32_1 = arith.constant 0 : i32
    return %c0_i32, %c0_i32_0 : i32, i32
  }
  func.func @transform_2(%arg0: i32, %arg1: i32) -> (i32, i32) {
    %c0_i32 = arith.constant 0 : i32
    %c0_i32_0 = arith.constant 0 : i32
    %c0_i32_1 = arith.constant 0 : i32
    return %c0_i32, %c0_i32_0 : i32, i32
  }
  func.func @transform_3(%arg0: i32, %arg1: i32) -> (i32, i32) {
    %c0_i32 = arith.constant 0 : i32
    %c0_i32_0 = arith.constant 0 : i32
    %c0_i32_1 = arith.constant 0 : i32
    return %c0_i32, %c0_i32_0 : i32, i32
  }
  func.func @transform_4(%arg0: i32, %arg1: i32) -> (i32, i32) {
    %c0_i32 = arith.constant 0 : i32
    %c0_i32_0 = arith.constant 0 : i32
    %c0_i32_1 = arith.constant 0 : i32
    return %c0_i32, %c0_i32_0 : i32, i32
  }
  func.func @transform_5(%arg0: i32, %arg1: i32) -> (i32, i32, i32) {
    %c0_i32 = arith.constant 0 : i32
    %c0_i32_0 = arith.constant 0 : i32
    return %arg0, %arg1, %c0_i32 : i32, i32, i32
  }
}

</mosaic_0001>

<bundles_post_ra>
// kernel: tpu_custom_call.1
= control target key start
LH: loop header
LB: loop body
LE: loop exit
PB: predicated region body
PF: predicated region fallthrough
CT: control target
= control target key end

     0   :  { %s2060_s0 = inlined_call_operand.hbm [shape: bf16[2,16,1024], index: 0, kind: input, shape index: {}]   ;;  %s2061_s1 = inlined_call_operand.hbm [shape: bf16[1024,128], index: 1, kind: input, shape index: {}]   ;;  %s2062_s2 = inlined_call_operand.vmem [shape: f32[1,128], index: 2, kind: input, shape index: {}]   ;;  %s2063_s3 = inlined_call_operand.hbm [shape: bf16[128,128], index: 3, kind: input, shape index: {}]   ;;  %s2064_s4 = inlined_call_operand.vmem [shape: f32[1,128], index: 4, kind: input, shape index: {}]   ;;  %s2065_s5 = inlined_call_operand.hbm [shape: f32[2,16,128], index: 5, kind: output, shape index: {}]  }
   0x1   :  { %2069 = sst [smem:[#allocation12_spill]] %s2061_s1 }
   0x2   :  { %10 = vsyncpa [#allocation3], 0 }
   0x3   :  { %12 = vsyncpa [#allocation3 + $0x1], 0 }
   0x4   :  { %13 = vsyncpa [#allocation6], 0 }
   0x5   :  { %14 = vsyncpa [#allocation4], 0 }
   0x6   :  { %16 = vsyncpa [#allocation4 + $0x1], 0  ;;  %s1855_s18 = smov 0   ;;  %s1857_s19 = smov 0  }
   0x7   :  { %s1859_s20 = smov 0   ;;  %s1861_s21 = smov 0  }
   0x8   :  { %s1863_s22 = smov 0   ;;  %s1865_s23 = smov 0  }
   0x9 LB: > { %s1264_s24 = sadd.s32 4294967295, %s1811_s23   ;;  %s1265_s25 = sadd.s32 4294967294, %s1811_s23   ;;  %s1811_s23 = sphi %s1865_s23, %s22_s23   ;;  %s1807_s22 = sphi %s1863_s22, %s2087_s22   ;;  %s1803_s21 = sphi %s1861_s21, %s2086_s21   ;;  %s1799_s20 = sphi %s1859_s20, %s2085_s20   ;;  %s1795_s19 = sphi %s1857_s19, %s2084_s19   ;;  %s1791_s18 = sphi %s1855_s18, %s2083_s18  }
   0xa   : > { %p56_p0 = scmp.ne.s32.totalorder %s1795_s19, %s1791_s18  ;;  %p1889_p1 = scmp.eq.s32.totalorder %s1264_s24, 0 }
   0xb   : > { %p1893_p2 = scmp.eq.s32.totalorder %s1264_s24, 1  ;;  %p172_p3 = scmp.eq.s32.totalorder %s1265_s25, 1 }
   0xc   : > { %s2070_s26 = scalar_select %p1889_p1, 1, 0 }
   0xd   : > { %p1899_p4 = por %p1889_p1, %p56_p0  ;;  %p1266_p5 = scmp.ge.s32.totalorder %s1811_s23, 1 }
   0xe   : > { %p1904_p6 = por %p172_p3, %p56_p0  ;;  %p179_p7 = scmp.lt.s32.totalorder %s1811_s23, 3 }
   0xf   : > { %s2072_s28 = scalar_select %p1899_p4, 1, 0 }
  0x10   : > { %s2073_s29 = scalar_select %p1904_p6, 1, 0 }
  0x11   : > { %p1909_p8 = pnand %p1266_p5, %p179_p7  ;;  %s1813_s6 = smov [#allocation5]  }
  0x12   : > { %s191_s7 = sshll.u32 %s1813_s6, 4  ;;  %s1814_s9 = smov [#allocation7]   ;;  %s192_s7 = int_to_ptr.vmem [resolvable:$true] %s191_s7 }
  0x13   : > { %p1496_p9 = pneg %p1909_p8  ;;  %s207_s10 = sshll.u32 %s1814_s9, 4  ;;  %s208_s10 = int_to_ptr.vmem [resolvable:$true] %s207_s10 }
  0x14   : > { %s1658_s11 = scalar_lea.vmem %s192_s7, 8192  ;;  %p1666_p5 = scmp.lt.s32.totalorder %s192_s7, %s192_s7 }
  0x15   : > { %p1918_p11 = pnand %p1496_p9, %p1889_p1  ;;  %p1659_p13 = scmp.ne.s32.totalorder %s192_s7, %s1658_s11 }
  0x16   : > { %p1667_p7 = scmp.lt.s32.totalorder %s1658_s11, %s1658_s11 }
  0x17   : > { %p1649_p12 = pneg %p1918_p11 }
  0x18   : > { %p1668_p10 = por %p1667_p7, %p1666_p5 }
  0x19   : > { %p1661_p0 = pnand %p1659_p13, %p1649_p12 }
  0x1b   : > { %p1662_p3 = pneg %p1661_p0 }
  0x1d   : > { %p1669_p9 = pnand %p1668_p10, %p1662_p3 }
  0x1f   : > { %1672 = shalt.err (!%p1669_p9)
}
  0x20   : > { %s1815_s12 = smov 64   ;;  %s1816_s13 = smov 4  }
  0x21   : > { %s2076_s1 = sld [smem:[#allocation12_spill]]  ;;  %s1684_s16 = scalar_lea.vmem %s208_s10, 1024 }
  0x22   : > { %p1685_p6 = scmp.ne.s32.totalorder %s208_s10, %s1684_s16  ;;  %p1692_p1 = scmp.lt.s32.totalorder %s208_s10, %s208_s10 }
  0x23   : > { %p1693_p4 = scmp.lt.s32.totalorder %s1684_s16, %s1684_s16 }
  0x24   : > { %p1687_p13 = pnand %p1685_p6, %p1649_p12 }
  0x25   : > { %p1694_p5 = por %p1693_p4, %p1692_p1 }
  0x26   : > { %p1688_p0 = pneg %p1687_p13 }
  0x27   : > { %1499 = dma.hbm_to_vmem [thread:$0]  (!%p1918_p11), %s2076_s1, 8192, %s192_s7, [#allocation6], %s1815_s12, %s1815_s12, %s1816_s13  }
  0x28   : > { %p1695_p10 = pnand %p1694_p5, %p1688_p0 }
  0x2a   : > { %1698 = shalt.err (!%p1695_p10)
}
  0x2b   : > { %1502 = dma.hbm_to_vmem [thread:$0]  (!%p1918_p11), %s2063_s3, 1024, %s208_s10, [#allocation6], %s1815_s12, %s1815_s12, %s1816_s13  }
  0x2c   : > { %s34_s25 = sadd.s32 1, %s1807_s22  ;;  %s43_s6 = sadd.s32 1, %s1799_s20 }
  0x2d   : > { %p36_p1 = scmp.ge.s32.totalorder %s34_s25, 2  ;;  %p50_p4 = scmp.ne.s32.totalorder %s1799_s20, %s1795_s19 }
  0x2e   : > { %p51_p6 = scmp.eq.s32.totalorder %s1811_s23, 0  ;;  %p1513_p12 = scmp.lt.s32.totalorder %s1811_s23, 2 }
  0x2f   : > { %s2089_s25 = smov (%p36_p1, %s34_s25), 0  ;;  %p1950_p7 = por %p1893_p2, %p50_p4 }
  0x30   : > { %p52_p3 = por %p51_p6, %p50_p4  ;;  %s38_s8 = ssub.s32 %s1807_s22, %s2089_s25 }
  0x31   : > { %s224_s9 = sand.u32 1, %s1799_s20   ;;  %p41_p9 = scmp.eq.s32.totalorder %s38_s8, 0 }
  0x32   : > { %s1270_s10 = sshll.u32 %s224_s9, 6  ;;  %s1365_s11 = sshll.u32 %s1807_s22, 10 }
  0x33   : > { %s1959_s12 = scalar_select %p41_p9, %s1799_s20, %s43_s6  }
  0x34   : > { %s237_s15 = scalar_lea.hbm %s2060_s0, %s1365_s11  ;;  %s228_s16 = scalar_lea.vmem [#allocation2], %s1270_s10 }
  0x35   : > { %s238_s17 = sshll.u32 %s228_s16, 4  ;;  %p1966_p11 = pnand %p1513_p12, %p52_p3  ;;  %s239_s17 = int_to_ptr.vmem [resolvable:$true] %s238_s17 }
  0x36   : > { %s225_s24 = scalar_lea.sflag [#allocation3], %s224_s9  ;;  %s1712_s8 = scalar_lea.vmem %s239_s17, 1024 }
  0x37   : > { %p1701_p2 = pneg %p1966_p11  ;;  %p1713_p13 = scmp.ne.s32.totalorder %s239_s17, %s1712_s8 }
  0x38   : > { %s1817_s6 = smov [#allocation2]  }
  0x39   : > { %p1715_p0 = pnand %p1713_p13, %p1701_p2  ;;  %s1717_s1 = sshll.u32 %s1817_s6, 4  ;;  %s1718_s1 = int_to_ptr.vmem [resolvable:$false] %s1717_s1 }
  0x3a   : > { %s1719_s11 = scalar_lea.vmem %s1718_s1, 2048  ;;  %p1720_p10 = scmp.lt.s32.totalorder %s239_s17, %s1718_s1 }
  0x3b   : > { %p1716_p5 = pneg %p1715_p0  ;;  %p1721_p1 = scmp.lt.s32.totalorder %s1719_s11, %s1712_s8 }
  0x3d   : > { %p1722_p4 = por %p1721_p1, %p1720_p10 }
  0x3f   : > { %p1723_p6 = pnand %p1722_p4, %p1716_p5 }
  0x41   : > { %1726 = shalt.err (!%p1723_p6)
}
  0x42   : > { %s1818_s10 = smov 512   ;;  %s1819_s13 = smov 32  }
  0x43   : > { %1506 = dma.hbm_to_vmem [thread:$0]  (!%p1966_p11), %s237_s15, 1024, %s239_s17, %s225_s24, %s1818_s10, %s1818_s10, %s1819_s13  }
  0x44   : > { %250 = sbr.rel (%p1909_p8) target bundleno = 565 (0x235), region = 40  ;;  %s1977_s9 = sand.u32 (!%p1909_p8), 1, %s1795_s19  }
  0x45   : > { %s1274_s14 = sshll.u32 (!%p1909_p8), %s1977_s9, 6  ;;  %s253_s1 = scalar_lea.sflag (!%p1909_p8), [#allocation3], %s1977_s9 }
  0x46   : > { %s1981_s16 = scalar_lea.vmem (!%p1909_p8), [#allocation2], %s1274_s14  ;;  %p2079_p12 = scmp.ne.s32.totalorder (!%p1909_p8), %s2072_s28, 0 }
  0x49   : > { %1778 = dma.done.wait (%p2079_p12), %s253_s1, 1024  }
  0x4a   : > { %1780 = vsyncadd (%p2079_p12), %s253_s1, 4294966272  ;;  %p2080_p3 = scmp.ne.s32.totalorder %s2070_s26, 0 }
  0x4c   : > { %1782 = dma.done.wait (%p2080_p3), [#allocation6], 9216  }
  0x4d   : > { %1784 = vsyncadd (%p2080_p3), [#allocation6], 4294958080  ;;  %v1575_v0 = vld [vmem:[#allocation5 + $0x78] sm:$0xff]   ;;  %v1579_v4 = vld [vmem:[#allocation5 + $0x70] sm:$0xff]   ;;  %vm1821_vm0 = vmmov 0   ;;  %s1277_s30 = sshll.u32 %s1977_s9, 4 }
  0x4e   : > { %v1576_v1 = vld [vmem:[#allocation5 + $0xf8] sm:$0xff]   ;;  %1367 = vmatprep.subr.bf16.mxu0 %v1575_v0  ;;  %v1580_v5 = vld [vmem:[#allocation5 + $0xf0] sm:$0xff]   ;;  %v1583_v8 = vld [vmem:[#allocation5 + $0x68] sm:$0xff]   ;;  %s290_s27 = scalar_lea.vmem [#allocation8], %s1277_s30  ;;  %s1366_s8 = sshll.u32 %s1803_s21, 8 }
  0x4f   : > { %v1577_v2 = vld [vmem:[#allocation5 + $0x38] sm:$0xff]   ;;  %1389 = vmatprep.subr.bf16.mxu1 %v1576_v1  ;;  %v1581_v6 = vld [vmem:[#allocation5 + $0x30] sm:$0xff]   ;;  %v1584_v9 = vld [vmem:[#allocation5 + $0xe8] sm:$0xff]   ;;  %s1158_s24 = sshll.u32 %s290_s27, 4  ;;  %s2012_s10 = scalar_lea.hbm %s2065_s5, %s1366_s8  ;;  %s2007_s24 = int_to_ptr.vmem [resolvable:$true] %s1158_s24 }
  0x50   : > { %v1578_v3 = vld [vmem:[#allocation5 + $0xb8] sm:$0xff]   ;;  %1368 = vmatpush3.bf16.msra.mxu0 %v1577_v2  ;;  %v1582_v7 = vld [vmem:[#allocation5 + $0xb0] sm:$0xff]   ;;  %v1585_v10 = vld [vmem:[#allocation5 + $0x28] sm:$0xff]   ;;  %s1143_s13 = scalar_lea.sflag [#allocation4], %s1977_s9  ;;  %s1727_s14 = scalar_lea.vmem %s2007_s24, 256 }
  0x51   : > { %1390 = vmatpush3.bf16.msra.mxu1 %v1578_v3  ;;  %1369 = vmatprep.subr.bf16.mxu0 %v1579_v4  ;;  %v1586_v11 = vld [vmem:[#allocation5 + $0xa8] sm:$0xff]   ;;  %v1587_v12 = vld [vmem:[#allocation5 + $0x60] sm:$0xff]   ;;  %v1591_v16 = vld [vmem:[#allocation5 + $0x58] sm:$0xff]   ;;  %p1728_p8 = scmp.ne.s32.totalorder %s2007_s24, %s1727_s14  ;;  %s1822_s21 = smov [#allocation8]  }
  0x52   : > { %1391 = vmatprep.subr.bf16.mxu1 %v1580_v5  ;;  %v1588_v13 = vld [vmem:[#allocation5 + $0xe0] sm:$0xff]   ;;  %v1592_v17 = vld [vmem:[#allocation5 + $0xd8] sm:$0xff]   ;;  %v1595_v20 = vld [vmem:[#allocation5 + $0x50] sm:$0xff]   ;;  %s1731_s1 = sshll.u32 %s1822_s21, 4  ;;  %s1732_s1 = int_to_ptr.vmem [resolvable:$false] %s1731_s1 }
  0x53   : > { %v1589_v14 = vld [vmem:[#allocation5 + $0x20] sm:$0xff]   ;;  %v1593_v18 = vld [vmem:[#allocation5 + $0x18] sm:$0xff]   ;;  %v1596_v21 = vld [vmem:[#allocation5 + $0xd0] sm:$0xff]   ;;  %p1729_p9 = pnand %p1728_p8, %p1950_p7  ;;  %p1734_p2 = scmp.lt.s32.totalorder %s2007_s24, %s1732_s1 }
  0x54   : > { %1370 = vmatpush3.bf16.msra.mxu0 %v1581_v6  ;;  %v1590_v15 = vld [vmem:[#allocation5 + $0xa0] sm:$0xff]   ;;  %v1594_v19 = vld [vmem:[#allocation5 + $0x98] sm:$0xff]   ;;  %v1597_v22 = vld [vmem:[#allocation5 + $0x10] sm:$0xff]  }
  0x55   : > { %1392 = vmatpush3.bf16.msra.mxu1 %v1582_v7  ;;  %1371 = vmatprep.subr.bf16.mxu0 %v1583_v8  ;;  %v1598_v23 = vld [vmem:[#allocation5 + $0x90] sm:$0xff]   ;;  %v1599_v24 = vld [vmem:[#allocation5 + $0x48] sm:$0xff]   ;;  %v1603_v28 = vld [vmem:[#allocation5 + $0x40] sm:$0xff]   ;;  %p1730_p11 = pneg %p1729_p9 }
  0x56   : > { %1393 = vmatprep.subr.bf16.mxu1 %v1584_v9  ;;  %v1600_v25 = vld [vmem:[#allocation5 + $0xc8] sm:$0xff]   ;;  %v1604_v29 = vld [vmem:[#allocation5 + $0xc0] sm:$0xff]   ;;  %v1607_v40 = vld [vmem:[#allocation5 + $0x178] sm:$0xff]  }
  0x57   : > { %v1601_v26 = vld [vmem:[#allocation5 + $0x8] sm:$0xff]   ;;  %v1605_v30 = vld [vmem:[#allocation5] sm:$0xff]   ;;  %v1608_v41 = vld [vmem:[#allocation5 + $0x1f8] sm:$0xff]  }
  0x58   : > { %1372 = vmatpush3.bf16.msra.mxu0 %v1585_v10  ;;  %v1602_v27 = vld [vmem:[#allocation5 + $0x88] sm:$0xff]   ;;  %v1606_v31 = vld [vmem:[#allocation5 + $0x80] sm:$0xff]   ;;  %v1609_v42 = vld [vmem:[#allocation5 + $0x138] sm:$0xff]  }
  0x59   : > { %1394 = vmatpush3.bf16.msra.mxu1 %v1586_v11  ;;  %1373 = vmatprep.subr.bf16.mxu0 %v1587_v12  ;;  %v294_v32 = vld [vmem:[%s1981_s16] sm:$0xff]  ;;  %v295_v34 = vld [vmem:[%s1981_s16 + $0x8] sm:$0xff]  ;;  %v1610_v43 = vld [vmem:[#allocation5 + $0x1b8] sm:$0xff]  }
  0x5a   : > { %1395 = vmatprep.subr.bf16.mxu1 %v1588_v13  ;;  %v298_v33 = vld [vmem:[%s1981_s16 + $0x20] sm:$0xff]  ;;  %v299_v37 = vld [vmem:[%s1981_s16 + $0x28] sm:$0xff]  ;;  %v1611_v44 = vld [vmem:[#allocation5 + $0x170] sm:$0xff]  }
  0x5b   : > { %v1279_v35 = vcombine.low %v294_v32, %v298_v33  ;;  %v1280_v36 = vcombine.high %v294_v32, %v298_v33  ;;  %v1281_v38 = vcombine.low %v295_v34, %v299_v37  ;;  %v1282_v39 = vcombine.high %v295_v34, %v299_v37  ;;  %v1612_v45 = vld [vmem:[#allocation5 + $0x1f0] sm:$0xff]   ;;  %v1615_v48 = vld [vmem:[#allocation5 + $0x168] sm:$0xff]   ;;  %v1619_v52 = vld [vmem:[#allocation5 + $0x160] sm:$0xff]  }
  0x5c   : > { %1374 = vmatpush3.bf16.msra.mxu0 %v1589_v14  ;;  %v1613_v46 = vld [vmem:[#allocation5 + $0x130] sm:$0xff]   ;;  %v1616_v49 = vld [vmem:[#allocation5 + $0x1e8] sm:$0xff]   ;;  %v1620_v53 = vld [vmem:[#allocation5 + $0x1e0] sm:$0xff]  }
  0x5d   : > { %1396 = vmatpush3.bf16.msra.mxu1 %v1590_v15  ;;  %1375 = vmatprep.subr.bf16.mxu0 %v1591_v16  ;;  %v1614_v47 = vld [vmem:[#allocation5 + $0x1b0] sm:$0xff]   ;;  %v1617_v50 = vld [vmem:[#allocation5 + $0x128] sm:$0xff]   ;;  %v1621_v54 = vld [vmem:[#allocation5 + $0x120] sm:$0xff]  }
  0x5e   : > { %1397 = vmatprep.subr.bf16.mxu1 %v1592_v17  ;;  %893 = vmatprep.mubr.bf16.mxu0 %v1280_v36  ;;  %v1618_v51 = vld [vmem:[#allocation5 + $0x1a8] sm:$0xff]   ;;  %v1622_v55 = vld [vmem:[#allocation5 + $0x1a0] sm:$0xff]   ;;  %v1623_v56 = vld [vmem:[#allocation5 + $0x158] sm:$0xff]   ;;  %v1820_v17 = vmov 0.0  }
  0x5f   : > { %934 = vmatprep.mubr.bf16.mxu1 %v1282_v39  ;;  %v1624_v57 = vld [vmem:[#allocation5 + $0x1d8] sm:$0xff]   ;;  %v1627_v60 = vld [vmem:[#allocation5 + $0x150] sm:$0xff]   ;;  %v1631_v0 = vld [vmem:[#allocation5 + $0x148] sm:$0xff]  }
  0x60   : > { %1376 = vmatpush3.bf16.msra.mxu0 %v1593_v18  ;;  %v1625_v58 = vld [vmem:[#allocation5 + $0x118] sm:$0xff]   ;;  %v1628_v61 = vld [vmem:[#allocation5 + $0x1d0] sm:$0xff]   ;;  %v1632_v1 = vld [vmem:[#allocation5 + $0x1c8] sm:$0xff]  }
  0x61   : > { %1398 = vmatpush3.bf16.msra.mxu1 %v1594_v19  ;;  %1377 = vmatprep.subr.bf16.mxu0 %v1595_v20  ;;  %v1626_v59 = vld [vmem:[#allocation5 + $0x198] sm:$0xff]   ;;  %v1629_v62 = vld [vmem:[#allocation5 + $0x110] sm:$0xff]   ;;  %v1633_v2 = vld [vmem:[#allocation5 + $0x108] sm:$0xff]  }
  0x62   : > { %1399 = vmatprep.subr.bf16.mxu1 %v1596_v21  ;;  %v1630_v63 = vld [vmem:[#allocation5 + $0x190] sm:$0xff]   ;;  %v1634_v3 = vld [vmem:[#allocation5 + $0x188] sm:$0xff]   ;;  %v1635_v4 = vld [vmem:[#allocation5 + $0x140] sm:$0xff]  }
  0x63   : > { %v1636_v5 = vld [vmem:[#allocation5 + $0x1c0] sm:$0xff]   ;;  %v296_v8 = vld [vmem:[%s1981_s16 + $0x10] sm:$0xff]  ;;  %v297_v12 = vld [vmem:[%s1981_s16 + $0x18] sm:$0xff] }
  0x64   : > { %1378 = vmatpush3.bf16.msra.mxu0 %v1597_v22  ;;  %v1637_v6 = vld [vmem:[#allocation5 + $0x100] sm:$0xff]   ;;  %v300_v9 = vld [vmem:[%s1981_s16 + $0x30] sm:$0xff]  ;;  %v301_v13 = vld [vmem:[%s1981_s16 + $0x38] sm:$0xff]  ;;  %s1733_s16 = scalar_lea.vmem %s1732_s1, 512 }
  0x65   : > { %1400 = vmatpush3.bf16.msra.mxu1 %v1598_v23  ;;  %1379 = vmatprep.subr.bf16.mxu0 %v1599_v24  ;;  %v1638_v7 = vld [vmem:[#allocation5 + $0x180] sm:$0xff]   ;;  %v1283_v10 = vcombine.low %v296_v8, %v300_v9  ;;  %v1284_v11 = vcombine.high %v296_v8, %v300_v9  ;;  %v1285_v14 = vcombine.low %v297_v12, %v301_v13  ;;  %v1639_v16 = vld [vmem:[#allocation7 + $0x38] sm:$0xff]   ;;  %v1640_v18 = vld [vmem:[#allocation7 + $0x30] sm:$0xff]   ;;  %p1735_p13 = scmp.lt.s32.totalorder %s1733_s16, %s1727_s14 }
  0x66   : > { %1401 = vmatprep.subr.bf16.mxu1 %v1600_v25  ;;  %v1286_v15 = vcombine.high %v297_v12, %v301_v13  ;;  %v1641_v19 = vld [vmem:[#allocation7 + $0x28] sm:$0xff]   ;;  %v1642_v20 = vld [vmem:[#allocation7 + $0x20] sm:$0xff]   ;;  %v1643_v21 = vld [vmem:[#allocation7 + $0x18] sm:$0xff]  }
  0x67   : > { %v1644_v22 = vld [vmem:[#allocation7 + $0x10] sm:$0xff]   ;;  %v1645_v23 = vld [vmem:[#allocation7 + $0x8] sm:$0xff]   ;;  %v1646_v24 = vld [vmem:[#allocation7] sm:$0xff]   ;;  %p1736_p0 = por %p1735_p13, %p1734_p2 }
  0x68   : > { %1380 = vmatpush3.bf16.msra.mxu0 %v1601_v26  ;;  %v1278_v32 = vld [vmem:[%s2062_s2] ss:$0 sm:$0xff] }
  0x69   : > { %1402 = vmatpush3.bf16.msra.mxu1 %v1602_v27  ;;  %1381 = vmatprep.subr.bf16.mxu0 %v1603_v28  ;;  %p1737_p5 = pnand %p1736_p0, %p1730_p11 }
  0x6a   : > { %1403 = vmatprep.subr.bf16.mxu1 %v1604_v29 }
  0x6c   : > { %1382 = vmatpush3.bf16.msra.mxu0 %v1605_v30 }
  0x6d   : > { %1404 = vmatpush3.bf16.msra.mxu1 %v1606_v31  ;;  %1411 = vmatprep.subr.bf16.mxu0 %v1607_v40 }
  0x6e   : > { %1433 = vmatprep.subr.bf16.mxu1 %v1608_v41 }
  0x6f   : > { %894 = vmatmul.mubr.bf16.vlgmr.msra.gmra.mxu0 %v1279_v35 }
  0x70   : > { %935 = vmatmul.mubr.bf16.vlgmr.msra.gmra.mxu1 %v1281_v38  ;;  %1412 = vmatpush3.bf16.msra.mxu0 %v1609_v42 }
  0x71   : > { %1434 = vmatpush3.bf16.msra.mxu1 %v1610_v43  ;;  %1413 = vmatprep.subr.bf16.mxu0 %v1611_v44 }
  0x72   : > { %1435 = vmatprep.subr.bf16.mxu1 %v1612_v45  ;;  %975 = vmatprep.mubr.bf16.mxu0 %v1284_v11 }
  0x73   : > { %1016 = vmatprep.mubr.bf16.mxu1 %v1286_v15 }
  0x74   : > { %1414 = vmatpush3.bf16.msra.mxu0 %v1613_v46 }
  0x75   : > { %1436 = vmatpush3.bf16.msra.mxu1 %v1614_v47  ;;  %1415 = vmatprep.subr.bf16.mxu0 %v1615_v48 }
  0x76   : > { %1437 = vmatprep.subr.bf16.mxu1 %v1616_v49 }
  0x78   : > { %1416 = vmatpush3.bf16.msra.mxu0 %v1617_v50 }
  0x79   : > { %1438 = vmatpush3.bf16.msra.mxu1 %v1618_v51  ;;  %1417 = vmatprep.subr.bf16.mxu0 %v1619_v52 }
  0x7a   : > { %1439 = vmatprep.subr.bf16.mxu1 %v1620_v53 }
  0x7c   : > { %1418 = vmatpush3.bf16.msra.mxu0 %v1621_v54 }
  0x7d   : > { %1440 = vmatpush3.bf16.msra.mxu1 %v1622_v55  ;;  %1419 = vmatprep.subr.bf16.mxu0 %v1623_v56 }
  0x7e   : > { %1441 = vmatprep.subr.bf16.mxu1 %v1624_v57 }
  0x80   : > { %1420 = vmatpush3.bf16.msra.mxu0 %v1625_v58 }
  0x81   : > { %1442 = vmatpush3.bf16.msra.mxu1 %v1626_v59  ;;  %1421 = vmatprep.subr.bf16.mxu0 %v1627_v60 }
  0x82   : > { %1443 = vmatprep.subr.bf16.mxu1 %v1628_v61  ;;  %v1351_v61 = vld [vmem:[%s2064_s4] ss:$0 sm:$0xff] }
  0x84   : > { %1422 = vmatpush3.bf16.msra.mxu0 %v1629_v62 }
  0x85   : > { %1444 = vmatpush3.bf16.msra.mxu1 %v1630_v63  ;;  %1423 = vmatprep.subr.bf16.mxu0 %v1631_v0 }
  0x86   : > { %1445 = vmatprep.subr.bf16.mxu1 %v1632_v1 }
  0x88   : > { %1424 = vmatpush3.bf16.msra.mxu0 %v1633_v2 }
  0x89   : > { %1446 = vmatpush3.bf16.msra.mxu1 %v1634_v3  ;;  %1425 = vmatprep.subr.bf16.mxu0 %v1635_v4 }
  0x8a   : > { %1447 = vmatprep.subr.bf16.mxu1 %v1636_v5 }
  0x8c   : > { %1426 = vmatpush3.bf16.msra.mxu0 %v1637_v6 }
  0x8d   : > { %1448 = vmatpush3.bf16.msra.mxu1 %v1638_v7  ;;  %1464 = vmatprep.subr.bf16.mxu0 %v1820_v17 }
  0x8f   : > { %976 = vmatmul.mubr.bf16.vlgmr.msra.gmra.mxu0 %v1283_v10 }
  0x90   : > { %1017 = vmatmul.mubr.bf16.vlgmr.msra.gmra.mxu1 %v1285_v14  ;;  %1465 = vmatpush3.bf16.msra.mxu0 %v1639_v16 }
  0x91   : > { %1466 = vmatprep.subr.bf16.mxu0 %v1820_v17  ;;  %1480 = vmatprep.mubr.msk.bf16.mxu0 %vm1821_vm0, %v1820_v17 }
  0x94   : > { %1467 = vmatpush3.bf16.msra.mxu0 %v1640_v18 }
  0x95   : > { %1468 = vmatprep.subr.bf16.mxu0 %v1820_v17 }
  0x98   : > { %1469 = vmatpush3.bf16.msra.mxu0 %v1641_v19 }
  0x99   : > { %1470 = vmatprep.subr.bf16.mxu0 %v1820_v17 }
  0x9c   : > { %1471 = vmatpush3.bf16.msra.mxu0 %v1642_v20 }
  0x9d   : > { %1472 = vmatprep.subr.bf16.mxu0 %v1820_v17 }
  0xa0   : > { %1473 = vmatpush3.bf16.msra.mxu0 %v1643_v21 }
  0xa1   : > { %1474 = vmatprep.subr.bf16.mxu0 %v1820_v17 }
  0xa4   : > { %1475 = vmatpush3.bf16.msra.mxu0 %v1644_v22 }
  0xa5   : > { %1476 = vmatprep.subr.bf16.mxu0 %v1820_v17 }
  0xa8   : > { %1477 = vmatpush3.bf16.msra.mxu0 %v1645_v23 }
  0xa9   : > { %1478 = vmatprep.subr.bf16.mxu0 %v1820_v17 }
  0xac   : > { %1479 = vmatpush3.bf16.msra.mxu0 %v1646_v24 }
 0x12f   : > { %v1383_v25 = vpop.f32.mrf.mxu0 }
 0x130   : > { %v1405_v26 = vpop.f32.mrf.mxu1 }
 0x131   : > { %v1384_v27 = vpop.f32.mrf.mxu0 }
 0x132   : > { %v1406_v28 = vpop.f32.mrf.mxu1  ;;  %v1385_v30 = vadd.f32 %v1384_v27, %v1383_v25 }
 0x133   : > { %v1386_v29 = vpop.f32.mrf.mxu0  ;;  %v1407_v35 = vadd.f32 %v1406_v28, %v1405_v26 }
 0x134   : > { %v1408_v31 = vpop.f32.mrf.mxu1  ;;  %v896_v34 = vadd.f32 %v1385_v30, %v1278_v32 }
 0x135   : > { %v1387_v33 = vpop.f32.mrf.mxu0 }
 0x136   : > { %v1388_v36 = vadd.f32 %v1387_v33, %v1386_v29  ;;  %v1409_v37 = vpop.f32.mrf.mxu1  ;;  %v937_v41 = vadd.f32 %v1407_v35, %v896_v34 }
 0x137   : > { %v1410_v46 = vadd.f32 %v1409_v37, %v1408_v31 }
 0x138   : > { %v899_v42 = vadd.f32 %v1388_v36, %v1278_v32 }
 0x13a   : > { %v940_v50 = vadd.f32 %v1410_v46, %v899_v42 }
 0x14f   : > { %v1427_v38 = vpop.f32.mrf.mxu0 }
 0x150   : > { %v1449_v39 = vpop.f32.mrf.mxu1 }
 0x151   : > { %v1428_v40 = vpop.f32.mrf.mxu0 }
 0x152   : > { %v1429_v43 = vadd.f32 %v1428_v40, %v1427_v38  ;;  %v1450_v44 = vpop.f32.mrf.mxu1 }
 0x153   : > { %v1430_v45 = vpop.f32.mrf.mxu0  ;;  %v1451_v51 = vadd.f32 %v1450_v44, %v1449_v39 }
 0x154   : > { %v978_v47 = vadd.f32 %v1429_v43, %v937_v41  ;;  %v1452_v48 = vpop.f32.mrf.mxu1 }
 0x155   : > { %v1431_v49 = vpop.f32.mrf.mxu0 }
 0x156   : > { %v1432_v52 = vadd.f32 %v1431_v49, %v1430_v45  ;;  %v1453_v53 = vpop.f32.mrf.mxu1  ;;  %v1019_v54 = vadd.f32 %v1451_v51, %v978_v47 }
 0x157   : > { %v1454_v56 = vadd.f32 %v1453_v53, %v1452_v48 }
 0x158   : > { %v981_v55 = vadd.f32 %v1432_v52, %v940_v50  ;;  %v1025_v58 = vmax.f32 %v1019_v54, 0.0 }
 0x15a   : > { %v1022_v57 = vadd.f32 %v1454_v56, %v981_v55 }
 0x15c   : > { %v1026_v59 = vmax.f32 %v1022_v57, 0.0 }
 0x15e   : > { %v1027_v60 = vpack.c.bf16 %v1026_v59, %v1025_v58 }
 0x160   : > { %1481 = vmatmul.mubr.bf16.vlgmr.msra.gmra.mxu0 %v1027_v60 }
 0x220   : > { %v1133_v62 = vpop.f32.mrf.mxu0 }
 0x221   : > { %v1134_v63 = vadd.f32 %v1351_v61, %v1133_v62 }
 0x222   : > { %v1482_v0 = vpop.f32.mrf.mxu0 }
 0x223   : > { %1140 = vst [vmem:[%s290_s27] sm:$0xff] %v1134_v63 }
 0x224   : > { %v1136_v1 = vpop.f32.mrf.mxu0 }
 0x225   : > { %v1137_v2 = vadd.f32 %v1351_v61, %v1136_v1 }
 0x226   : > { %v1483_v3 = vpop.f32.mrf.mxu0 }
 0x227   : > { %1141 = vst [vmem:[%s290_s27 + $0x8] sm:$0xff] %v1137_v2 }
 0x228   : > { %1740 = shalt.err (!%p1737_p5)
}
 0x229   : > { %s1741_s26 = scalar_lea.hbm %s2012_s10, 256  ;;  %s1745_s15 = scalar_lea.hbm %s2065_s5, 512 }
 0x22a   : > { %p1742_p10 = scmp.ne.s32.totalorder %s2012_s10, %s1741_s26  ;;  %p1746_p6 = scmp.lt.s32.totalorder %s2012_s10, %s2065_s5 }
 0x22b   : > { %p1747_p12 = scmp.lt.s32.totalorder %s1745_s15, %s1741_s26 }
 0x22c   : > { %p1743_p1 = pnand %p1742_p10, %p1950_p7 }
 0x22d   : > { %p1748_p3 = por %p1747_p12, %p1746_p6 }
 0x22e   : > { %p1744_p4 = pneg %p1743_p1 }
 0x230   : > { %p1749_p8 = pnand %p1748_p3, %p1744_p4 }
 0x232   : > { %1752 = shalt.err (!%p1749_p8)
}
 0x233   : > { %s1823_s8 = smov 128   ;;  %s1824_s6 = smov 8  }
 0x234   : > { %1494 = dma.vmem_to_hbm [thread:$0]  (%p1950_p7), %s2007_s24, 256, %s2012_s10, %s1143_s13, %s1823_s8, %s1823_s8, %s1824_s6  }
 0x235 PF: > { %s1173_s11 = sand.u32 1, %s1791_s18   ;;  %p2081_p9 = scmp.ne.s32.totalorder %s2073_s29, 0 }
 0x236   : > { %p2082_p11 = scmp.ge.s32.totalorder %s1811_s23, 2  ;;  %s1174_s14 = scalar_lea.sflag [#allocation4], %s1173_s11 }
 0x238   : > { %p1508_p2 = pnand %p2082_p11, %p2081_p9 }
 0x23a   : > { %p1509_p13 = pneg %p1508_p2 }
 0x23c   : > { %1786 = dma.done.wait (%p1509_p13), %s1174_s14, 256  }
 0x23d   : > { %1788 = vsyncadd (%p1509_p13), %s1174_s14, 4294967040  ;;  %s22_s23 = sadd.s32 1, %s1811_s23   ;;  %s2083_s18 = smov %s1795_s19 }
 0x23e   : > { %p19_p0 = scmp.ge.s32.totalorder %s22_s23, 4   ;;  %s2084_s19 = smov %s1799_s20 }
 0x23f   : > { %s2085_s20 = smov %s1959_s12  ;;  %s2086_s21 = smov %s1807_s22 }
 0x240   : > { %s2087_s22 = smov %s2089_s25  ;;  %21 = sbr.rel (!%p19_p0) target bundleno = 9 (0x9), region = 93 }
 0x245   :  { %1179 = vsyncpa [#allocation3], 1 }
 0x246   :  { %1181 = vsyncpa [#allocation3 + $0x1], 1 }
 0x247   :  { %1182 = vsyncpa [#allocation6], 1 }
 0x248   :  { %1183 = vsyncpa [#allocation4], 1 }
 0x249   :  { %1185 = vsyncpa [#allocation4 + $0x1], 1 }

</bundles_post_ra>
